<compile_context>
chip_gen: v5e
topology: v5e:2x2
jax: 0.10.0
libtpu: 0.0.40
codegen_flags: <defaults>
</compile_context>

<pallas_src>
import functools

import jax
import jax.numpy as jnp
import numpy as np
from jax.experimental import pallas as pl
from jax.experimental.pallas import tpu as pltpu


_LANE = 128
_MAX_LANES = 4096


def _cdiv(a, b):
    return (a + b - 1) // b


def _round_up(a, b):
    return _cdiv(a, b) * b


def _vmem_capacity_bytes():
    """Physical VMEM per TensorCore; conservative 64 MiB if the query fails."""
    try:
        info = pltpu.get_tpu_info()
        cap = getattr(info, "vmem_capacity_bytes", None)
        if cap:
            return int(cap)
    except Exception:
        pass
    return 64 * 1024 * 1024


def _sublane_align(itemsize):
    return 8 * max(1, 4 // max(1, itemsize))


def _even_grid_rows(n_outer, rows, rb, align, small_vmem):
    """On 2-TensorCore (v7x-class, small-VMEM) parts, nudge the row block so the
    total grid-step count is even (a 3-step grid on 2 cores wastes ~33%)."""
    if not small_vmem or rb < 1:
        return rb
    steps0 = n_outer * _cdiv(rows, rb)
    if steps0 % 2 == 0 or steps0 > 32:
        return rb
    nb0 = _cdiv(rows, rb)
    for nb in range(nb0 + 1, nb0 + 8):
        cand = min(rows, _round_up(_cdiv(rows, nb), align))
        if cand >= 1 and (n_outer * _cdiv(rows, cand)) % 2 == 0:
            return cand
    return rb


# ----------------------------------------------------------------------------
# Fast path: single fused Pallas pass (requires W % 128 == 0).
# ----------------------------------------------------------------------------

def _haar_column_matrix(kt):
    """(kt, kt) matrix M with s_tile @ M = [low-pass pairs | high-pass pairs].

    For output column j < kt/2 :  +col(2j) +col(2j+1)
    For output column kt/2 + j :  -col(2j) +col(2j+1)
    Entries are exactly representable in bf16.
    """
    kth = kt // 2
    m = np.zeros((kt, kt), np.float32)
    j = np.arange(kth)
    m[2 * j, j] = 1.0
    m[2 * j + 1, j] = 1.0
    m[2 * j, kth + j] = -1.0
    m[2 * j + 1, kth + j] = 1.0
    return jnp.asarray(m, jnp.bfloat16)


def _dwt_fast_kernel(m_ref, x_ref, o_ref, *, width, kt, split_f32):
    """Single-pass Haar DWT on a (1, Gb, 2*W) input block.

    Input lane layout per row: [even H row | odd H row], each `width` wide.
    m_ref is the constant (kt, kt) column-pair butterfly matrix (bf16).
    Output block is (1, 4, Gb, Wh) with subband order (LL, HL, LH, HH).
    """
    kth = kt // 2
    m = m_ref[...]

    def _mxu(v):
        # f32 -> explicit 3-term bf16 decomposition (bf16_3x) so accuracy is
        # ~f32 without depending on how the MXU handles f32 operands.
        if not split_f32:
            return jnp.dot(v.astype(m.dtype), m,
                           preferred_element_type=jnp.float32)
        v0 = v.astype(jnp.bfloat16)
        r0 = v - v0.astype(jnp.float32)
        v1 = r0.astype(jnp.bfloat16)
        v2 = (r0 - v1.astype(jnp.float32)).astype(jnp.bfloat16)
        acc = jnp.dot(v0, m, preferred_element_type=jnp.float32)
        acc += jnp.dot(v1, m, preferred_element_type=jnp.float32)
        acc += jnp.dot(v2, m, preferred_element_type=jnp.float32)
        return acc

    for t in range(width // kt):
        lo = t * kt
        xa = x_ref[0, :, lo:lo + kt].astype(jnp.float32)                # even H rows
        xb = x_ref[0, :, width + lo:width + lo + kt].astype(jnp.float32)  # odd H rows
        s = (xa + xb) * 0.5                                             # row low-pass
        d = (xb - xa) * 0.5                                             # row high-pass
        out_s = _mxu(s)                                                 # [LL | HL]
        out_d = _mxu(d)                                                 # [LH | HH]
        cols = slice(t * kth, (t + 1) * kth)
        o_ref[0, 0, :, cols] = out_s[:, :kth].astype(o_ref.dtype)       # LL
        o_ref[0, 1, :, cols] = out_s[:, kth:].astype(o_ref.dtype)       # HL
        o_ref[0, 2, :, cols] = out_d[:, :kth].astype(o_ref.dtype)       # LH
        o_ref[0, 3, :, cols] = out_d[:, kth:].astype(o_ref.dtype)       # HH


def _dwt_fast_path(x, N, C, Hh, Wh):
    W = 2 * Wh
    G = C * Hh                             # rows per (image) after the free reshape
    itemsize = x.dtype.itemsize
    kt = 256 if W % 256 == 0 else 128      # column-tile width for the MXU stage

    vmem_cap = _vmem_capacity_bytes()
    small_vmem = vmem_cap <= 64 * 1024 * 1024

    align = _sublane_align(itemsize)
    row_bytes = 2 * W * itemsize
    target_block = max(1 << 20, vmem_cap // 20)   # ~6.4 MiB on 128 MiB, ~3.2 MiB on 64 MiB
    gb = max(align, (target_block // row_bytes) // align * align)
    if gb >= G:
        gb = G
    gb = _even_grid_rows(N, G, gb, align, small_vmem)

    block_bytes = gb * row_bytes
    vmem_limit = int(min(vmem_cap * 3 // 4,
                         max(32 * 1024 * 1024, 5 * block_bytes + (8 << 20))))

    xr = x.reshape(N, G, 2 * W)            # FREE view: row g = [even H row | odd H row]
    m = _haar_column_matrix(kt)
    split_f32 = x.dtype == jnp.float32

    kernel = functools.partial(_dwt_fast_kernel, width=W, kt=kt,
                               split_f32=split_f32)
    out = pl.pallas_call(
        kernel,
        grid=(N, _cdiv(G, gb)),
        in_specs=[
            pl.BlockSpec((kt, kt), lambda n, g: (0, 0)),       # resident constant
            pl.BlockSpec((1, gb, 2 * W), lambda n, g: (n, g, 0)),
        ],
        out_specs=pl.BlockSpec((1, 4, gb, Wh), lambda n, g: (n, 0, g, 0)),
        out_shape=jax.ShapeDtypeStruct((N, 4, G, Wh), x.dtype),
        compiler_params=pltpu.CompilerParams(
            dimension_semantics=("parallel", "parallel"),
            vmem_limit_bytes=vmem_limit,
        ),
    )(m, xr)
    # (N, 4, C*Hh, Wh) is a contiguous view of torch.cat((LL,HL,LH,HH), dim=1).
    return out.reshape(N, 4 * C, Hh, Wh)


# ----------------------------------------------------------------------------
# Fallback path (W % 128 != 0): two-pass, improved lane layout.
# ----------------------------------------------------------------------------

def _haar_butterfly_kernel(x_ref, o_ref):
    """Blocks are (1, 4, Rb, L).

    Input  axis-1 order: (even-row/even-col, even-row/odd-col,
                          odd-row/even-col,  odd-row/odd-col).
    Output axis-1 order: (LL, HL, LH, HH).
    """
    x_ee = x_ref[0, 0, :, :]
    x_eo = x_ref[0, 1, :, :]
    x_oe = x_ref[0, 2, :, :]
    x_oo = x_ref[0, 3, :, :]
    a = (x_ee + x_oe) * 0.5
    b = (x_eo + x_oo) * 0.5
    c = (x_oe - x_ee) * 0.5
    d = (x_oo - x_eo) * 0.5
    o_ref[0, 0, :, :] = a + b      # LL
    o_ref[0, 1, :, :] = b - a      # HL
    o_ref[0, 2, :, :] = c + d      # LH
    o_ref[0, 3, :, :] = d - c      # HH


def _plane_layout(Q):
    """Factor the flat per-(image, subband) plane Q as (R, L): prefer a lane
    width that is a multiple of 128 (unmasked stores), else the largest divisor
    of Q in [128, _MAX_LANES], else Q itself."""
    start = min(_MAX_LANES, (Q // _LANE) * _LANE)
    for l in range(start, _LANE - 1, -_LANE):
        if Q % l == 0:
            return Q // l, l
    for l in range(min(_MAX_LANES, Q), _LANE - 1, -1):
        if Q % l == 0:
            return Q // l, l
    return 1, Q


def _dwt_fallback_path(x, N, C, Hh, Wh):
    itemsize = x.dtype.itemsize
    Q = C * Hh * Wh
    R, L = _plane_layout(Q)

    vmem_cap = _vmem_capacity_bytes()
    small_vmem = vmem_cap <= 64 * 1024 * 1024
    align = _sublane_align(itemsize)
    target_block = max(1 << 20, vmem_cap // 16)
    row_bytes = 4 * L * itemsize
    rb = max(align, (target_block // row_bytes) // align * align)
    if rb >= R:
        rb = R
    rb = _even_grid_rows(N, R, rb, align, small_vmem)
    block_bytes = 4 * rb * L * itemsize
    vmem_limit = int(min(vmem_cap * 3 // 4,
                         max(32 * 1024 * 1024, 5 * block_bytes + (4 << 20))))

    # Polyphase rearrangement (N, C, H, W) -> (N, 4, R, L): the one remaining
    # XLA pass on this path.  The column de-interleave needs lane-stride-2
    # access; the fast path above avoids it via the MXU but needs W % 128 == 0.
    xp = x.reshape(N, C, Hh, 2, Wh, 2)
    xp = jnp.transpose(xp, (0, 3, 5, 1, 2, 4))      # (N, 2, 2, C, Hh, Wh)
    xp = xp.reshape(N, 4, R, L)

    spec = pl.BlockSpec((1, 4, rb, L), lambda n, r: (n, 0, r, 0))
    out = pl.pallas_call(
        _haar_butterfly_kernel,
        grid=(N, _cdiv(R, rb)),
        in_specs=[spec],
        out_specs=spec,
        out_shape=jax.ShapeDtypeStruct((N, 4, R, L), x.dtype),
        compiler_params=pltpu.CompilerParams(
            dimension_semantics=("parallel", "parallel"),
            vmem_limit_bytes=vmem_limit,
        ),
    )(xp)
    return out.reshape(N, 4 * C, Hh, Wh)


# ----------------------------------------------------------------------------
# Public API
# ----------------------------------------------------------------------------

def wave_decompose(x):
    """Single-level Haar DWT: (N, C, H, W) -> (N, 4*C, H//2, W//2)."""
    N, C, H, W = x.shape
    assert H % 2 == 0 and W % 2 == 0, "spatial dims must be even for Haar DWT"
    Hh, Wh = H // 2, W // 2
    if W % 128 == 0:
        return _dwt_fast_path(x, N, C, Hh, Wh)
    return _dwt_fallback_path(x, N, C, Hh, Wh)


class WaveDecompose:
    """Mirror of the PyTorch module; the Haar DWT has no learnable parameters."""

    def __init__(self, input_channel):
        self.input_channel = input_channel

    def __call__(self, x):
        return wave_decompose(x)


def _wave_decompose_ref(x):
    """Pure-JAX reference mirroring the standard PyTorch DWT implementation."""
    x01 = x[:, :, 0::2, :] / 2.0
    x02 = x[:, :, 1::2, :] / 2.0
    x1 = x01[:, :, :, 0::2]
    x2 = x02[:, :, :, 0::2]
    x3 = x01[:, :, :, 1::2]
    x4 = x02[:, :, :, 1::2]
    return jnp.concatenate([x1 + x2 + x3 + x4,
                            -x1 - x2 + x3 + x4,
                            -x1 + x2 - x3 + x4,
                            x1 - x2 - x3 + x4], axis=1)


if __name__ == "__main__":
    # TODO(synk): DWTCompose's source is not provided; this implements the
    # canonical fixed-coefficient Haar DWT (no learnable parameters).
    key = jax.random.PRNGKey(0)
    k0, k1 = jax.random.split(key)
    fwd = jax.jit(wave_decompose)

    # Small shape from the module spec -> exercises the fallback path.
    x_small = jax.random.normal(k0, (2, 4, 16, 16), dtype=jnp.float32)
    out_small = jax.block_until_ready(fwd(x_small))
    assert out_small.shape == (2, 16, 8, 8), out_small.shape
    ref_small = _wave_decompose_ref(x_small)
    assert jnp.allclose(out_small, ref_small, atol=1e-5, rtol=1e-5), \
        "fallback-path mismatch vs reference"

    # Lane-dense shape -> exercises the fused single-pass (MXU) path.
    x_big = jax.random.normal(k1, (2, 8, 256, 256), dtype=jnp.float32)
    out_big = jax.block_until_ready(fwd(x_big))
    assert out_big.shape == (2, 32, 128, 128), out_big.shape
    ref_big = _wave_decompose_ref(x_big)
    assert jnp.allclose(out_big, ref_big, atol=1e-4, rtol=1e-4), \
        "fast-path mismatch vs reference"

    print("KERNEL_OK")
</pallas_src>

<mosaic_0001>
module attributes {stable_mosaic.version = 11 : i64} {
  func.func @_haar_butterfly_kernel(%arg0: i32, %arg1: i32, %arg2: memref<1x4x1x256xf32, #tpu.memory_space<vmem>>, %arg3: memref<1x4x1x256xf32, #tpu.memory_space<vmem>>) attributes {dimension_semantics = [#tpu.dimension_semantics<parallel>, #tpu.dimension_semantics<parallel>], iteration_bounds = array<i64: 2, 1>, scalar_prefetch = 0 : i64, scratch_operands = 0 : i64, tpu.core_type = #tpu.core_type<tc>, window_params = [{transform_indices = @transform_0, window_bounds = array<i64: 1, 4, 1, 256>}, {transform_indices = @transform_1, window_bounds = array<i64: 1, 4, 1, 256>}]} {
    %c0 = arith.constant 0 : index
    %c0_0 = arith.constant 0 : index
    %c0_1 = arith.constant 0 : index
    %c0_2 = arith.constant 0 : index
    %0 = vector.load %arg2[%c0, %c0_0, %c0_1, %c0_2] : memref<1x4x1x256xf32, #tpu.memory_space<vmem>>, vector<1x1x1x256xf32>
    %1 = vector.shape_cast %0 : vector<1x1x1x256xf32> to vector<1x256xf32>
    %c0_3 = arith.constant 0 : index
    %c1 = arith.constant 1 : index
    %c0_4 = arith.constant 0 : index
    %c0_5 = arith.constant 0 : index
    %2 = vector.load %arg2[%c0_3, %c1, %c0_4, %c0_5] : memref<1x4x1x256xf32, #tpu.memory_space<vmem>>, vector<1x1x1x256xf32>
    %3 = vector.shape_cast %2 : vector<1x1x1x256xf32> to vector<1x256xf32>
    %c0_6 = arith.constant 0 : index
    %c2 = arith.constant 2 : index
    %c0_7 = arith.constant 0 : index
    %c0_8 = arith.constant 0 : index
    %4 = vector.load %arg2[%c0_6, %c2, %c0_7, %c0_8] : memref<1x4x1x256xf32, #tpu.memory_space<vmem>>, vector<1x1x1x256xf32>
    %5 = vector.shape_cast %4 : vector<1x1x1x256xf32> to vector<1x256xf32>
    %c0_9 = arith.constant 0 : index
    %c3 = arith.constant 3 : index
    %c0_10 = arith.constant 0 : index
    %c0_11 = arith.constant 0 : index
    %6 = vector.load %arg2[%c0_9, %c3, %c0_10, %c0_11] : memref<1x4x1x256xf32, #tpu.memory_space<vmem>>, vector<1x1x1x256xf32>
    %7 = vector.shape_cast %6 : vector<1x1x1x256xf32> to vector<1x256xf32>
    %8 = arith.addf %1, %5 : vector<1x256xf32>
    %cst = arith.constant 5.000000e-01 : f32
    %9 = vector.broadcast %cst : f32 to vector<1x256xf32>
    %10 = arith.mulf %8, %9 : vector<1x256xf32>
    %11 = arith.addf %3, %7 : vector<1x256xf32>
    %cst_12 = arith.constant 5.000000e-01 : f32
    %12 = vector.broadcast %cst_12 : f32 to vector<1x256xf32>
    %13 = arith.mulf %11, %12 : vector<1x256xf32>
    %14 = arith.subf %5, %1 : vector<1x256xf32>
    %cst_13 = arith.constant 5.000000e-01 : f32
    %15 = vector.broadcast %cst_13 : f32 to vector<1x256xf32>
    %16 = arith.mulf %14, %15 : vector<1x256xf32>
    %17 = arith.subf %7, %3 : vector<1x256xf32>
    %cst_14 = arith.constant 5.000000e-01 : f32
    %18 = vector.broadcast %cst_14 : f32 to vector<1x256xf32>
    %19 = arith.mulf %17, %18 : vector<1x256xf32>
    %20 = arith.addf %10, %13 : vector<1x256xf32>
    %c0_15 = arith.constant 0 : index
    %c0_16 = arith.constant 0 : index
    %c0_17 = arith.constant 0 : index
    %c0_18 = arith.constant 0 : index
    %21 = vector.load %arg3[%c0_15, %c0_16, %c0_17, %c0_18] : memref<1x4x1x256xf32, #tpu.memory_space<vmem>>, vector<1x1x1x256xf32>
    %22 = vector.shape_cast %21 : vector<1x1x1x256xf32> to vector<1x256xf32>
    %23 = vector.shape_cast %20 : vector<1x256xf32> to vector<1x1x1x256xf32>
    tpu.vector_store %arg3[%c0_15, %c0_16, %c0_17, %c0_18], %23 {strides = array<i32>} : memref<1x4x1x256xf32, #tpu.memory_space<vmem>>, vector<1x1x1x256xf32>,
    %24 = arith.subf %13, %10 : vector<1x256xf32>
    %c0_19 = arith.constant 0 : index
    %c1_20 = arith.constant 1 : index
    %c0_21 = arith.constant 0 : index
    %c0_22 = arith.constant 0 : index
    %25 = vector.load %arg3[%c0_19, %c1_20, %c0_21, %c0_22] : memref<1x4x1x256xf32, #tpu.memory_space<vmem>>, vector<1x1x1x256xf32>
    %26 = vector.shape_cast %25 : vector<1x1x1x256xf32> to vector<1x256xf32>
    %27 = vector.shape_cast %24 : vector<1x256xf32> to vector<1x1x1x256xf32>
    tpu.vector_store %arg3[%c0_19, %c1_20, %c0_21, %c0_22], %27 {strides = array<i32>} : memref<1x4x1x256xf32, #tpu.memory_space<vmem>>, vector<1x1x1x256xf32>,
    %28 = arith.addf %16, %19 : vector<1x256xf32>
    %c0_23 = arith.constant 0 : index
    %c2_24 = arith.constant 2 : index
    %c0_25 = arith.constant 0 : index
    %c0_26 = arith.constant 0 : index
    %29 = vector.load %arg3[%c0_23, %c2_24, %c0_25, %c0_26] : memref<1x4x1x256xf32, #tpu.memory_space<vmem>>, vector<1x1x1x256xf32>
    %30 = vector.shape_cast %29 : vector<1x1x1x256xf32> to vector<1x256xf32>
    %31 = vector.shape_cast %28 : vector<1x256xf32> to vector<1x1x1x256xf32>
    tpu.vector_store %arg3[%c0_23, %c2_24, %c0_25, %c0_26], %31 {strides = array<i32>} : memref<1x4x1x256xf32, #tpu.memory_space<vmem>>, vector<1x1x1x256xf32>,
    %32 = arith.subf %19, %16 : vector<1x256xf32>
    %c0_27 = arith.constant 0 : index
    %c3_28 = arith.constant 3 : index
    %c0_29 = arith.constant 0 : index
    %c0_30 = arith.constant 0 : index
    %33 = vector.load %arg3[%c0_27, %c3_28, %c0_29, %c0_30] : memref<1x4x1x256xf32, #tpu.memory_space<vmem>>, vector<1x1x1x256xf32>
    %34 = vector.shape_cast %33 : vector<1x1x1x256xf32> to vector<1x256xf32>
    %35 = vector.shape_cast %32 : vector<1x256xf32> to vector<1x1x1x256xf32>
    tpu.vector_store %arg3[%c0_27, %c3_28, %c0_29, %c0_30], %35 {strides = array<i32>} : memref<1x4x1x256xf32, #tpu.memory_space<vmem>>, vector<1x1x1x256xf32>,
    return
  }
  func.func @transform_0(%arg0: i32, %arg1: i32) -> (i32, i32, i32, i32) {
    %c0_i32 = arith.constant 0 : i32
    %c0_i32_0 = arith.constant 0 : i32
    %c0_i32_1 = arith.constant 0 : i32
    return %arg0, %c0_i32, %arg1, %c0_i32_0 : i32, i32, i32, i32
  }
  func.func @transform_1(%arg0: i32, %arg1: i32) -> (i32, i32, i32, i32) {
    %c0_i32 = arith.constant 0 : i32
    %c0_i32_0 = arith.constant 0 : i32
    %c0_i32_1 = arith.constant 0 : i32
    return %arg0, %c0_i32, %arg1, %c0_i32_0 : i32, i32, i32, i32
  }
}

</mosaic_0001>

<bundles_post_ra>
// kernel: wave_decompose.1
= control target key start
LH: loop header
LB: loop body
LE: loop exit
PB: predicated region body
PF: predicated region fallthrough
CT: control target
= control target key end

     0   :  { %s334_s6 = smov 0   ;;  %s336_s7 = smov 0   ;;  %s367_s0 = inlined_call_operand.vmem [shape: f32[2,4,1,256], index: 0, kind: input, shape index: {}]   ;;  %s368_s1 = inlined_call_operand.vmem [shape: f32[2,4,1,256], index: 1, kind: output, shape index: {}]  }
   0x1   :  { %s338_s8 = smov 0  }
   0x2 LB: > { %s23_s9 = sadd.s32 1, %s318_s7  ;;  %p265_p0 = scmp.ge.s32.totalorder %s322_s8, 1  ;;  %s322_s8 = sphi %s338_s8, %s11_s8   ;;  %s318_s7 = sphi %s336_s7, %s370_s7   ;;  %s314_s6 = sphi %s334_s6, %s369_s6  }
   0x3   : > { %p25_p1 = scmp.ge.s32.totalorder %s23_s9, 2  ;;  %p106_p2 = scmp.lt.s32.totalorder %s322_s8, 3 }
   0x5   : > { %s372_s9 = smov (%p25_p1, %s23_s9), 0  ;;  %p107_p3 = pnand %p265_p0, %p106_p2 }
   0x6   : > { %p132_p4 = scmp.lt.s32.totalorder (!%p107_p3), %s314_s6, 1 }
   0x7   : > { %110 = sbr.rel (%p107_p3) target bundleno = 27 (0x1b), region = 24 }
   0xc   : > { %s374_s6 = smov (!%p132_p4, %s314_s6), 1  ;;  %v164_v5 = vlaneseq }
   0xd   : > { %s266_s10 = sshll.u32 %s374_s6, 3 }
   0xe   : > { %s139_s13 = scalar_lea.vmem %s367_s0, %s266_s10  ;;  %s147_s16 = scalar_lea.vmem %s368_s1, %s266_s10  ;;  %vm166_vm0 = vcmp.lt.s32.totalorder %v164_v5, 256 }
   0xf   : > { %v148_v0 = vld [vmem:[%s139_s13] sm:$0x3]  ;;  %v268_v1 = vld [vmem:[%s139_s13 + $0x2] sm:$0x3]  ;;  %v269_v2 = vld [vmem:[%s139_s13 + $0x4] sm:$0x3] }
  0x10   : > { %v270_v3 = vld [vmem:[%s139_s13 + $0x6] sm:$0x3]  ;;  %v155_v4 = vadd.f32 %v269_v2, %v148_v0  ;;  %v159_v6 = vsub.f32 %v269_v2, %v148_v0 }
  0x11   : > { %v157_v7 = vadd.f32 %v270_v3, %v268_v1  ;;  %v161_v8 = vsub.f32 %v270_v3, %v268_v1 }
  0x12   : > { %v156_v9 = vmul.f32 0.5, %v155_v4  ;;  %v160_v10 = vmul.f32 0.5, %v159_v6 }
  0x13   : > { %v158_v11 = vmul.f32 0.5, %v157_v7  ;;  %v162_v12 = vmul.f32 0.5, %v161_v8 }
  0x15   : > { %v163_v13 = vadd.f32 %v158_v11, %v156_v9  ;;  %v169_v14 = vsub.f32 %v158_v11, %v156_v9  ;;  %v172_v15 = vadd.f32 %v162_v12, %v160_v10  ;;  %v175_v16 = vsub.f32 %v162_v12, %v160_v10 }
  0x17   : > { %168 = vst.msk [vmem:[%s147_s16] sm:$0x3] %vm166_vm0, %v163_v13 }
  0x18   : > { %271 = vst.msk [vmem:[%s147_s16 + $0x2] sm:$0x3] %vm166_vm0, %v169_v14 }
  0x19   : > { %272 = vst.msk [vmem:[%s147_s16 + $0x4] sm:$0x3] %vm166_vm0, %v172_v15 }
  0x1a   : > { %273 = vst.msk [vmem:[%s147_s16 + $0x6] sm:$0x3] %vm166_vm0, %v175_v16 }
  0x1b PF: > { %s11_s8 = sadd.s32 1, %s322_s8   ;;  %s369_s6 = smov %s318_s7 }
  0x1c   : > { %p8_p5 = scmp.ge.s32.totalorder %s11_s8, 4   ;;  %s370_s7 = smov %s372_s9 }
  0x1e   :  { %10 = sbr.rel (!%p8_p5) target bundleno = 2 (0x2), region = 60 }

</bundles_post_ra>
